<compile_context>
chip_gen: v5e
topology: v5e:2x2
jax: 0.10.0
libtpu: 0.0.40
codegen_flags: <defaults>
</compile_context>

<pallas_src>
import functools

import jax
import jax.numpy as jnp
import numpy as np
from jax import lax
from jax.experimental import pallas as pl
from jax.experimental.pallas import tpu as pltpu

LANE = 128
_BN_EPS = 1e-5


def _round_up(x, m):
    return ((x + m - 1) // m) * m


def _fused_encoder_kernel(*refs, layer_cfg, n_param_refs, inv_n):
    """Whole encoder fused. refs = (x_ref, adj_ref, *param_refs, o_ref).

    layer_cfg: static tuple of (batchnorm, active, skip) per layer, so the layer
    loop fully unrolls at trace time.  x / adj / weights arrive as bf16 (MXU
    inputs, f32 accumulation); everything else is f32.
    """
    x_ref, adj_ref = refs[0], refs[1]
    param_refs = refs[2:2 + n_param_refs]
    o_ref = refs[2 + n_param_refs]

    z = x_ref[...]              # bf16 padded node features; f32 after layer 0
    idx = 0
    for (batchnorm, active, skip) in layer_cfg:
        w = param_refs[idx][...]; idx += 1                 # bf16 (din_p, dout_p)
        if batchnorm:
            gamma = param_refs[idx][...]; idx += 1         # f32 (1, dout_p)
            beta = param_refs[idx][...]; idx += 1
        else:
            bias = param_refs[idx][...]; idx += 1

        # Same association as the reference: support = z @ W, out = A @ support.
        # (All padded feature dims are equal here, so the (A@z)@W association has
        #  identical padded FLOPs -- the old "min(din,dout)" branch was dead.)
        zb = z if z.dtype == jnp.bfloat16 else z.astype(jnp.bfloat16)
        support = jnp.dot(zb, w, preferred_element_type=jnp.float32)
        # adj_ref is re-read each layer (cheap VMEM vld) instead of being held
        # live across the unrolled layers -> lower vreg pressure, no spills.
        out = jnp.dot(adj_ref[...], support.astype(jnp.bfloat16),
                      preferred_element_type=jnp.float32)

        if batchnorm:
            # nn.BatchNorm1d (training mode): batch stats, biased variance,
            # eps=1e-5.  Padded node rows of `out` are exactly zero, so
            # single-pass sums divided by the TRUE node count give exact stats.
            # (The pre-BN bias add is cancelled by mean subtraction -> dropped.)
            s1 = jnp.sum(out, axis=0, keepdims=True)
            s2 = jnp.sum(out * out, axis=0, keepdims=True)
            mean = s1 * inv_n
            var = s2 * inv_n - mean * mean
            scale = gamma * lax.rsqrt(var + _BN_EPS)       # rsqrt -> EUP slot
            shift = beta - mean * scale
            out = out * scale + shift                      # folded BN: 2 VPU passes
        else:
            out = out + bias                               # last layer: plain bias
        if active:
            out = jnp.maximum(out, 0.0)                    # ReLU
        if skip:
            out = out + z                                  # residual (din == dout)
        z = out

    o_ref[...] = z


def make_graph_encoder(params, skip_connect=True):
    """Pre-pads / casts the parameters ONCE and returns a jitted forward(x, adj).

    params: list of (weight (din,dout), bias (dout,), gamma (dout,), beta (dout,))
    mirroring GNNLayer; forward semantics match GraphEncoder.forward.
    """
    n_layers = len(params)
    dims = [params[0][0].shape[0]] + [w.shape[1] for (w, _, _, _) in params]
    # Lane-dense padding: every feature dim -> multiple of 128 so stores are
    # full-width.  Zero-padded weights / gamma / beta keep padded lanes zero.
    pdims = [_round_up(d, LANE) for d in dims]

    param_ops = []
    layer_cfg = []
    for i, (w, b, gamma, beta) in enumerate(params):
        batchnorm = i < n_layers - 1
        active = i < n_layers - 1
        skip = skip_connect and (0 < i < n_layers - 1)
        if skip and dims[i] != dims[i + 1]:
            raise ValueError("residual skip requires din == dout")
        pad_in, pad_out = pdims[i] - dims[i], pdims[i + 1] - dims[i + 1]
        param_ops.append(jnp.pad(w.astype(jnp.bfloat16),
                                 ((0, pad_in), (0, pad_out))))
        if batchnorm:
            # bias before BN is a no-op (cancelled by mean subtraction) -> dropped.
            param_ops.append(jnp.pad(gamma.astype(jnp.float32), (0, pad_out)).reshape(1, -1))
            param_ops.append(jnp.pad(beta.astype(jnp.float32), (0, pad_out)).reshape(1, -1))
        else:
            param_ops.append(jnp.pad(b.astype(jnp.float32), (0, pad_out)).reshape(1, -1))
        layer_cfg.append((batchnorm, active, skip))
    layer_cfg = tuple(layer_cfg)
    n_param_refs = len(param_ops)

    # Generation-aware VMEM ceiling: ~48 MiB on v7x (64 MiB physical),
    # ~96 MiB on v5e/v6e (128 MiB physical).
    try:
        vmem_cap = int(getattr(pltpu.get_tpu_info(), "vmem_capacity_bytes", 0) or 0)
    except Exception:
        vmem_cap = 0
    if vmem_cap <= 0:
        vmem_cap = 64 << 20          # conservative (v7x-sized) fallback
    vmem_ceiling = (vmem_cap * 3) // 4

    vmem_space = pl.BlockSpec(memory_space=pltpu.MemorySpace.VMEM)

    @jax.jit
    def forward(x, adj):
        n = x.shape[0]
        n_pad = _round_up(n, LANE)   # lane-dense (N,N) adjacency, aligned rows
        x_p = jnp.pad(x.astype(jnp.bfloat16),
                      ((0, n_pad - n), (0, pdims[0] - dims[0])))
        adj_p = jnp.pad(adj.astype(jnp.bfloat16),
                        ((0, n_pad - n), (0, n_pad - n)))

        operands = [x_p, adj_p] + list(param_ops)
        op_bytes = sum(int(np.prod(op.shape)) * op.dtype.itemsize for op in operands)
        scratch_bytes = 6 * n_pad * max(pdims) * 4   # out + a few f32 intermediates
        vmem_limit = int(min(vmem_ceiling,
                             max(32 << 20, 2 * (op_bytes + scratch_bytes))))

        kernel = functools.partial(_fused_encoder_kernel,
                                   layer_cfg=layer_cfg,
                                   n_param_refs=n_param_refs,
                                   inv_n=1.0 / n)
        out = pl.pallas_call(
            kernel,
            out_shape=jax.ShapeDtypeStruct((n_pad, pdims[-1]), jnp.float32),
            in_specs=[vmem_space] * len(operands),
            out_specs=vmem_space,
            compiler_params=pltpu.CompilerParams(vmem_limit_bytes=vmem_limit),
        )(*operands)
        return out[:n, :dims[-1]]

    return forward


def init_graph_encoder_params(key, encoder_dim):
    """Deterministic init matching GNNLayer.__init__:
       weight ~ xavier_uniform, bias = 0, BN gamma = 1, beta = 0."""
    params = []
    for i in range(len(encoder_dim) - 1):
        din, dout = encoder_dim[i], encoder_dim[i + 1]
        key, sub = jax.random.split(key)
        bound = jnp.sqrt(6.0 / (din + dout))
        w = jax.random.uniform(sub, (din, dout), jnp.float32, -bound, bound)
        b = jnp.zeros((dout,), jnp.float32)
        gamma = jnp.ones((dout,), jnp.float32)
        beta = jnp.zeros((dout,), jnp.float32)
        params.append((w, b, gamma, beta))
    return params


def _reference_forward(x, adj, params, skip_connect=True):
    """Pure-JAX f32 reference mirroring the PyTorch GraphEncoder forward."""
    hp = jax.lax.Precision.HIGHEST
    n_layers = len(params)
    z = x
    for i, (w, b, gamma, beta) in enumerate(params):
        out = jnp.dot(adj, jnp.dot(z, w, precision=hp), precision=hp) + b
        if i < n_layers - 1:
            mean = jnp.mean(out, axis=0, keepdims=True)
            var = jnp.mean(jnp.square(out - mean), axis=0, keepdims=True)
            out = (out - mean) * jax.lax.rsqrt(var + _BN_EPS)
            out = out * gamma + beta
            out = jnp.maximum(out, 0.0)
            if skip_connect and i > 0:
                out = out + z
        z = out
    return z


if __name__ == "__main__":
    key = jax.random.PRNGKey(0)

    N = 64                          # number of graph nodes
    encoder_dim = [16, 32, 32, 8]   # Din -> hidden -> hidden -> Dout (middle dims equal for skip)

    k_x, k_a, k_p = jax.random.split(key, 3)
    x = jax.random.normal(k_x, (N, encoder_dim[0]), jnp.float32)

    # Dense symmetric row-normalized adjacency (self-loops included).
    a_raw = (jax.random.uniform(k_a, (N, N)) < 0.1).astype(jnp.float32)
    a_sym = jnp.maximum(a_raw, a_raw.T) + jnp.eye(N, dtype=jnp.float32)
    adj = a_sym / jnp.sum(a_sym, axis=1, keepdims=True)

    params = init_graph_encoder_params(k_p, encoder_dim)

    encoder = make_graph_encoder(params, skip_connect=True)   # params padded once
    z = jax.block_until_ready(encoder(x, adj))
    assert z.shape == (N, encoder_dim[-1])

    z_ref = jax.block_until_ready(_reference_forward(x, adj, params, skip_connect=True))
    # bf16 MXU inputs (f32 accumulation) vs the f32 HIGHEST-precision reference:
    # measured elementwise error is O(1e-3) over 3 layers; 2e-2 leaves wide margin.
    np.testing.assert_allclose(np.asarray(z), np.asarray(z_ref), rtol=2e-2, atol=2e-2)

    print("KERNEL_OK")
</pallas_src>

<mosaic_0001>
module attributes {stable_mosaic.version = 11 : i64} {
  func.func @_fused_encoder_kernel(%arg0: memref<128x128xbf16, #tpu.memory_space<vmem>>, %arg1: memref<128x128xbf16, #tpu.memory_space<vmem>>, %arg2: memref<128x128xbf16, #tpu.memory_space<vmem>>, %arg3: memref<1x128xf32, #tpu.memory_space<vmem>>, %arg4: memref<1x128xf32, #tpu.memory_space<vmem>>, %arg5: memref<128x128xbf16, #tpu.memory_space<vmem>>, %arg6: memref<1x128xf32, #tpu.memory_space<vmem>>, %arg7: memref<1x128xf32, #tpu.memory_space<vmem>>, %arg8: memref<128x128xbf16, #tpu.memory_space<vmem>>, %arg9: memref<1x128xf32, #tpu.memory_space<vmem>>, %arg10: memref<128x128xf32, #tpu.memory_space<vmem>>) attributes {dimension_semantics = [], scalar_prefetch = 0 : i64, scratch_operands = 0 : i64, tpu.core_type = #tpu.core_type<tc>} {
    %c0 = arith.constant 0 : index
    %c0_0 = arith.constant 0 : index
    %0 = vector.load %arg0[%c0, %c0_0] : memref<128x128xbf16, #tpu.memory_space<vmem>>, vector<128x128xbf16>
    %c0_1 = arith.constant 0 : index
    %c0_2 = arith.constant 0 : index
    %1 = vector.load %arg2[%c0_1, %c0_2] : memref<128x128xbf16, #tpu.memory_space<vmem>>, vector<128x128xbf16>
    %c0_3 = arith.constant 0 : index
    %c0_4 = arith.constant 0 : index
    %2 = vector.load %arg3[%c0_3, %c0_4] : memref<1x128xf32, #tpu.memory_space<vmem>>, vector<1x128xf32>
    %c0_5 = arith.constant 0 : index
    %c0_6 = arith.constant 0 : index
    %3 = vector.load %arg4[%c0_5, %c0_6] : memref<1x128xf32, #tpu.memory_space<vmem>>, vector<1x128xf32>
    %cst = arith.constant dense<0.000000e+00> : vector<128x128xf32>
    %4 = tpu.matmul %0, %1, %cst {dimension_numbers = #tpu.dot_dimension_numbers<[1], [0], [0], [1], [0, 0, 1, 1], [], []>} : vector<128x128xbf16>, vector<128x128xbf16>, vector<128x128xf32> -> vector<128x128xf32>
    %c0_7 = arith.constant 0 : index
    %c0_8 = arith.constant 0 : index
    %5 = vector.load %arg1[%c0_7, %c0_8] : memref<128x128xbf16, #tpu.memory_space<vmem>>, vector<128x128xbf16>
    %6 = arith.truncf %4 : vector<128x128xf32> to vector<128x128xbf16>
    %cst_9 = arith.constant dense<0.000000e+00> : vector<128x128xf32>
    %7 = tpu.matmul %5, %6, %cst_9 {dimension_numbers = #tpu.dot_dimension_numbers<[1], [0], [0], [1], [0, 0, 1, 1], [], []>} : vector<128x128xbf16>, vector<128x128xbf16>, vector<128x128xf32> -> vector<128x128xf32>
    %cst_10 = arith.constant dense<0.000000e+00> : vector<128xf32>
    %8 = vector.multi_reduction <add>, %7, %cst_10 [0] : vector<128x128xf32> to vector<128xf32>
    %9 = vector.shape_cast %8 : vector<128xf32> to vector<1x128xf32>
    %10 = arith.mulf %7, %7 : vector<128x128xf32>
    %cst_11 = arith.constant dense<0.000000e+00> : vector<128xf32>
    %11 = vector.multi_reduction <add>, %10, %cst_11 [0] : vector<128x128xf32> to vector<128xf32>
    %12 = vector.shape_cast %11 : vector<128xf32> to vector<1x128xf32>
    %cst_12 = arith.constant 1.562500e-02 : f32
    %13 = vector.broadcast %cst_12 : f32 to vector<1x128xf32>
    %14 = arith.mulf %9, %13 : vector<1x128xf32>
    %cst_13 = arith.constant 1.562500e-02 : f32
    %15 = vector.broadcast %cst_13 : f32 to vector<1x128xf32>
    %16 = arith.mulf %12, %15 : vector<1x128xf32>
    %17 = arith.mulf %14, %14 : vector<1x128xf32>
    %18 = arith.subf %16, %17 : vector<1x128xf32>
    %cst_14 = arith.constant 9.99999974E-6 : f32
    %19 = vector.broadcast %cst_14 : f32 to vector<1x128xf32>
    %20 = arith.addf %18, %19 : vector<1x128xf32>
    %21 = math.rsqrt %20 : vector<1x128xf32>
    %22 = arith.mulf %2, %21 : vector<1x128xf32>
    %23 = arith.mulf %14, %22 : vector<1x128xf32>
    %24 = arith.subf %3, %23 : vector<1x128xf32>
    %25 = vector.broadcast %22 : vector<1x128xf32> to vector<128x128xf32>
    %26 = arith.mulf %7, %25 : vector<128x128xf32>
    %27 = vector.broadcast %24 : vector<1x128xf32> to vector<128x128xf32>
    %28 = arith.addf %26, %27 : vector<128x128xf32>
    %cst_15 = arith.constant 0.000000e+00 : f32
    %29 = vector.broadcast %cst_15 : f32 to vector<128x128xf32>
    %30 = arith.maximumf %28, %29 : vector<128x128xf32>
    %c0_16 = arith.constant 0 : index
    %c0_17 = arith.constant 0 : index
    %31 = vector.load %arg5[%c0_16, %c0_17] : memref<128x128xbf16, #tpu.memory_space<vmem>>, vector<128x128xbf16>
    %c0_18 = arith.constant 0 : index
    %c0_19 = arith.constant 0 : index
    %32 = vector.load %arg6[%c0_18, %c0_19] : memref<1x128xf32, #tpu.memory_space<vmem>>, vector<1x128xf32>
    %c0_20 = arith.constant 0 : index
    %c0_21 = arith.constant 0 : index
    %33 = vector.load %arg7[%c0_20, %c0_21] : memref<1x128xf32, #tpu.memory_space<vmem>>, vector<1x128xf32>
    %34 = arith.truncf %30 : vector<128x128xf32> to vector<128x128xbf16>
    %cst_22 = arith.constant dense<0.000000e+00> : vector<128x128xf32>
    %35 = tpu.matmul %34, %31, %cst_22 {dimension_numbers = #tpu.dot_dimension_numbers<[1], [0], [0], [1], [0, 0, 1, 1], [], []>} : vector<128x128xbf16>, vector<128x128xbf16>, vector<128x128xf32> -> vector<128x128xf32>
    %c0_23 = arith.constant 0 : index
    %c0_24 = arith.constant 0 : index
    %36 = vector.load %arg1[%c0_23, %c0_24] : memref<128x128xbf16, #tpu.memory_space<vmem>>, vector<128x128xbf16>
    %37 = arith.truncf %35 : vector<128x128xf32> to vector<128x128xbf16>
    %cst_25 = arith.constant dense<0.000000e+00> : vector<128x128xf32>
    %38 = tpu.matmul %36, %37, %cst_25 {dimension_numbers = #tpu.dot_dimension_numbers<[1], [0], [0], [1], [0, 0, 1, 1], [], []>} : vector<128x128xbf16>, vector<128x128xbf16>, vector<128x128xf32> -> vector<128x128xf32>
    %cst_26 = arith.constant dense<0.000000e+00> : vector<128xf32>
    %39 = vector.multi_reduction <add>, %38, %cst_26 [0] : vector<128x128xf32> to vector<128xf32>
    %40 = vector.shape_cast %39 : vector<128xf32> to vector<1x128xf32>
    %41 = arith.mulf %38, %38 : vector<128x128xf32>
    %cst_27 = arith.constant dense<0.000000e+00> : vector<128xf32>
    %42 = vector.multi_reduction <add>, %41, %cst_27 [0] : vector<128x128xf32> to vector<128xf32>
    %43 = vector.shape_cast %42 : vector<128xf32> to vector<1x128xf32>
    %cst_28 = arith.constant 1.562500e-02 : f32
    %44 = vector.broadcast %cst_28 : f32 to vector<1x128xf32>
    %45 = arith.mulf %40, %44 : vector<1x128xf32>
    %cst_29 = arith.constant 1.562500e-02 : f32
    %46 = vector.broadcast %cst_29 : f32 to vector<1x128xf32>
    %47 = arith.mulf %43, %46 : vector<1x128xf32>
    %48 = arith.mulf %45, %45 : vector<1x128xf32>
    %49 = arith.subf %47, %48 : vector<1x128xf32>
    %cst_30 = arith.constant 9.99999974E-6 : f32
    %50 = vector.broadcast %cst_30 : f32 to vector<1x128xf32>
    %51 = arith.addf %49, %50 : vector<1x128xf32>
    %52 = math.rsqrt %51 : vector<1x128xf32>
    %53 = arith.mulf %32, %52 : vector<1x128xf32>
    %54 = arith.mulf %45, %53 : vector<1x128xf32>
    %55 = arith.subf %33, %54 : vector<1x128xf32>
    %56 = vector.broadcast %53 : vector<1x128xf32> to vector<128x128xf32>
    %57 = arith.mulf %38, %56 : vector<128x128xf32>
    %58 = vector.broadcast %55 : vector<1x128xf32> to vector<128x128xf32>
    %59 = arith.addf %57, %58 : vector<128x128xf32>
    %cst_31 = arith.constant 0.000000e+00 : f32
    %60 = vector.broadcast %cst_31 : f32 to vector<128x128xf32>
    %61 = arith.maximumf %59, %60 : vector<128x128xf32>
    %62 = arith.addf %61, %30 : vector<128x128xf32>
    %c0_32 = arith.constant 0 : index
    %c0_33 = arith.constant 0 : index
    %63 = vector.load %arg8[%c0_32, %c0_33] : memref<128x128xbf16, #tpu.memory_space<vmem>>, vector<128x128xbf16>
    %c0_34 = arith.constant 0 : index
    %c0_35 = arith.constant 0 : index
    %64 = vector.load %arg9[%c0_34, %c0_35] : memref<1x128xf32, #tpu.memory_space<vmem>>, vector<1x128xf32>
    %65 = arith.truncf %62 : vector<128x128xf32> to vector<128x128xbf16>
    %cst_36 = arith.constant dense<0.000000e+00> : vector<128x128xf32>
    %66 = tpu.matmul %65, %63, %cst_36 {dimension_numbers = #tpu.dot_dimension_numbers<[1], [0], [0], [1], [0, 0, 1, 1], [], []>} : vector<128x128xbf16>, vector<128x128xbf16>, vector<128x128xf32> -> vector<128x128xf32>
    %c0_37 = arith.constant 0 : index
    %c0_38 = arith.constant 0 : index
    %67 = vector.load %arg1[%c0_37, %c0_38] : memref<128x128xbf16, #tpu.memory_space<vmem>>, vector<128x128xbf16>
    %68 = arith.truncf %66 : vector<128x128xf32> to vector<128x128xbf16>
    %cst_39 = arith.constant dense<0.000000e+00> : vector<128x128xf32>
    %69 = tpu.matmul %67, %68, %cst_39 {dimension_numbers = #tpu.dot_dimension_numbers<[1], [0], [0], [1], [0, 0, 1, 1], [], []>} : vector<128x128xbf16>, vector<128x128xbf16>, vector<128x128xf32> -> vector<128x128xf32>
    %70 = vector.broadcast %64 : vector<1x128xf32> to vector<128x128xf32>
    %71 = arith.addf %69, %70 : vector<128x128xf32>
    %c0_40 = arith.constant 0 : index
    %c0_41 = arith.constant 0 : index
    %72 = vector.load %arg10[%c0_40, %c0_41] : memref<128x128xf32, #tpu.memory_space<vmem>>, vector<128x128xf32>
    tpu.vector_store %arg10[%c0_40, %c0_41], %71 {strides = array<i32>} : memref<128x128xf32, #tpu.memory_space<vmem>>, vector<128x128xf32>,
    return
  }
}

</mosaic_0001>

<bundles_post_ra>
// kernel: forward.1
= control target key start
LH: loop header
LB: loop body
LE: loop exit
PB: predicated region body
PF: predicated region fallthrough
CT: control target
= control target key end

     0   :  { %s1826_s2 = inlined_call_operand.vmem [shape: bf16[128,128], index: 2, kind: input, shape index: {}]   ;;  %s1827_s0 = inlined_call_operand.vmem [shape: bf16[128,128], index: 0, kind: input, shape index: {}]   ;;  %s1828_s1 = inlined_call_operand.vmem [shape: bf16[128,128], index: 1, kind: input, shape index: {}]   ;;  %s1829_s5 = inlined_call_operand.vmem [shape: bf16[128,128], index: 5, kind: input, shape index: {}]   ;;  %s1830_s3 = inlined_call_operand.vmem [shape: f32[1,128], index: 3, kind: input, shape index: {}, may-alias: {3,6}]   ;;  %s1831_s4 = inlined_call_operand.vmem [shape: f32[1,128], index: 4, kind: input, shape index: {}, may-alias: {4,7,9}]   ;;  %s1832_s8 = inlined_call_operand.vmem [shape: bf16[128,128], index: 8, kind: input, shape index: {}]   ;;  %s1833_s6 = inlined_call_operand.vmem [shape: f32[1,128], index: 6, kind: input, shape index: {}, may-alias: {3,6}]   ;;  %s1834_s7 = inlined_call_operand.vmem [shape: f32[1,128], index: 7, kind: input, shape index: {}, may-alias: {4,7,9}]   ;;  %s1835_s9 = inlined_call_operand.vmem [shape: f32[1,128], index: 9, kind: input, shape index: {}, may-alias: {4,7,9}]   ;;  %s1836_s10 = inlined_call_operand.vmem [shape: f32[128,128], index: 10, kind: output, shape index: {}]  }
   0x1   :  { %v1168_v0 = vld [vmem:[%s1826_s2 + $0x38] sm:$0xff]  ;;  %v1167_v1 = vld [vmem:[%s1826_s2 + $0x30] sm:$0xff]  ;;  %v1166_v2 = vld [vmem:[%s1826_s2 + $0x28] sm:$0xff] }
   0x2   :  { %1193 = vmatpush.bf16.msra.mxu2 %v1168_v0  ;;  %165 = vmatpush.bf16.msra.mxu0 %v1168_v0  ;;  %v1165_v3 = vld [vmem:[%s1826_s2 + $0x20] sm:$0xff]  ;;  %v1164_v4 = vld [vmem:[%s1826_s2 + $0x18] sm:$0xff]  ;;  %v1163_v5 = vld [vmem:[%s1826_s2 + $0x10] sm:$0xff] }
   0x3   :  { %v1162_v6 = vld [vmem:[%s1826_s2 + $0x8] sm:$0xff]  ;;  %v1161_v7 = vld [vmem:[%s1826_s2] sm:$0xff]  ;;  %v1159_v12 = vld [vmem:[%s1827_s0 + $0x30] sm:$0xff] }
   0x4   :  { %v1157_v8 = vld [vmem:[%s1827_s0 + $0x20] sm:$0xff]  ;;  %v1158_v10 = vld [vmem:[%s1827_s0 + $0x28] sm:$0xff]  ;;  %v1155_v13 = vld [vmem:[%s1827_s0 + $0x10] sm:$0xff] }
   0x5   :  { %v1153_v9 = vld [vmem:[%s1827_s0] sm:$0xff]  ;;  %v1154_v11 = vld [vmem:[%s1827_s0 + $0x8] sm:$0xff]  ;;  %v1160_v14 = vld [vmem:[%s1827_s0 + $0x38] sm:$0xff] }
   0x6   :  { %1194 = vmatpush.bf16.msra.mxu2 %v1167_v1  ;;  %166 = vmatpush.bf16.msra.mxu0 %v1167_v1  ;;  %v1156_v15 = vld [vmem:[%s1827_s0 + $0x18] sm:$0xff]  ;;  %v1320_v40 = vld [vmem:[%s1828_s1] sm:$0xff]  ;;  %v1332_v42 = vld [vmem:[%s1828_s1 + $0x8] sm:$0xff] }
   0x7   :  { %v1325_v41 = vld [vmem:[%s1828_s1 + $0x20] sm:$0xff]  ;;  %v1337_v43 = vld [vmem:[%s1828_s1 + $0x28] sm:$0xff]  ;;  %v1344_v44 = vld [vmem:[%s1828_s1 + $0x10] sm:$0xff] }
   0x8   :  { %v1349_v45 = vld [vmem:[%s1828_s1 + $0x30] sm:$0xff]  ;;  %v1356_v46 = vld [vmem:[%s1828_s1 + $0x18] sm:$0xff] }
   0x9   :  { %v1361_v47 = vld [vmem:[%s1828_s1 + $0x38] sm:$0xff] }
   0xa   :  { %1195 = vmatpush.bf16.msra.mxu2 %v1166_v2  ;;  %167 = vmatpush.bf16.msra.mxu0 %v1166_v2 }
   0xe   :  { %1196 = vmatpush.bf16.msra.mxu2 %v1165_v3  ;;  %168 = vmatpush.bf16.msra.mxu0 %v1165_v3 }
  0x12   :  { %1197 = vmatpush.bf16.msra.mxu2 %v1164_v4  ;;  %169 = vmatpush.bf16.msra.mxu0 %v1164_v4 }
  0x16   :  { %1198 = vmatpush.bf16.msra.mxu2 %v1163_v5  ;;  %170 = vmatpush.bf16.msra.mxu0 %v1163_v5 }
  0x1a   :  { %1199 = vmatpush.bf16.msra.mxu2 %v1162_v6  ;;  %171 = vmatpush.bf16.msra.mxu0 %v1162_v6 }
  0x1e   :  { %1200 = vmatpush.bf16.msra.mxu2 %v1161_v7  ;;  %172 = vmatpush.bf16.msra.mxu0 %v1161_v7 }
  0x21   :  { %193 = vmatmul.bf16.vlgmr.msra.gmra.mxu2 %v1157_v8  ;;  %173 = vmatmul.bf16.vlgmr.msra.gmra.mxu0 %v1153_v9 }
  0x31   :  { %198 = vmatmul.bf16.gmra.mxu2 %v1158_v10  ;;  %178 = vmatmul.bf16.gmra.mxu0 %v1154_v11 }
  0x41   :  { %203 = vmatmul.bf16.gmra.mxu2 %v1159_v12  ;;  %183 = vmatmul.bf16.gmra.mxu0 %v1155_v13 }
  0x51   :  { %208 = vmatmul.bf16.gmra.mxu2 %v1160_v14  ;;  %188 = vmatmul.bf16.gmra.mxu0 %v1156_v15 }
  0x9e   :  { %v174_v17 = vpop.f32.mrf.mxu0 }
  0xa4   :  { %v194_v16 = vpop.f32.mrf.mxu2 }
  0xa6   :  { %v176_v19 = vpop.f32.mrf.mxu0 }
  0xa7   :  { %v230_v39 = vpack.c.bf16 %v176_v19, %v174_v17 }
  0xac   :  { %v196_v18 = vpop.f32.mrf.mxu2 }
  0xad   :  { %v234_v34 = vpack.c.bf16 %v196_v18, %v194_v16 }
  0xae   :  { %v179_v21 = vpop.f32.mrf.mxu0 }
  0xb4   :  { %v199_v20 = vpop.f32.mrf.mxu2 }
  0xb6   :  { %v181_v23 = vpop.f32.mrf.mxu0 }
  0xb7   :  { %v231_v38 = vpack.c.bf16 %v181_v23, %v179_v21 }
  0xbc   :  { %v201_v22 = vpop.f32.mrf.mxu2 }
  0xbd   :  { %v235_v33 = vpack.c.bf16 %v201_v22, %v199_v20 }
  0xbe   :  { %v184_v25 = vpop.f32.mrf.mxu0 }
  0xc4   :  { %v204_v24 = vpop.f32.mrf.mxu2 }
  0xc6   :  { %v186_v28 = vpop.f32.mrf.mxu0 }
  0xc7   :  { %v232_v37 = vpack.c.bf16 %v186_v28, %v184_v25 }
  0xcc   :  { %v206_v26 = vpop.f32.mrf.mxu2 }
  0xcd   :  { %v236_v32 = vpack.c.bf16 %v206_v26, %v204_v24  ;;  %v1184_v26 = vld [vmem:[%s1829_s5 + $0x38] sm:$0xff] }
  0xce   :  { %v189_v31 = vpop.f32.mrf.mxu0  ;;  %539 = vmatpush.bf16.msrb.mxu2 %v1184_v26 }
  0xd4   :  { %v209_v27 = vpop.f32.mrf.mxu2 }
  0xd6   :  { %v191_v35 = vpop.f32.mrf.mxu0 }
  0xd7   :  { %v233_v36 = vpack.c.bf16 %v191_v35, %v189_v31 }
  0xdc   :  { %v211_v29 = vpop.f32.mrf.mxu2 }
  0xdd   :  { %v237_v30 = vpack.c.bf16 %v211_v29, %v209_v27 }
  0xdf   :  { %286 = vmatpush.bf16.msra.mxu1 %v237_v30  ;;  %1201 = vmatpush.bf16.msra.mxu3 %v237_v30 }
  0xe3   :  { %287 = vmatpush.bf16.msra.mxu1 %v236_v32  ;;  %1202 = vmatpush.bf16.msra.mxu3 %v236_v32 }
  0xe7   :  { %288 = vmatpush.bf16.msra.mxu1 %v235_v33  ;;  %1203 = vmatpush.bf16.msra.mxu3 %v235_v33  ;;  %v1183_v33 = vld [vmem:[%s1829_s5 + $0x30] sm:$0xff] }
  0xe8   :  { %540 = vmatpush.bf16.msrb.mxu2 %v1183_v33 }
  0xeb   :  { %289 = vmatpush.bf16.msra.mxu1 %v234_v34  ;;  %1204 = vmatpush.bf16.msra.mxu3 %v234_v34 }
  0xef   :  { %290 = vmatpush.bf16.msra.mxu1 %v233_v36  ;;  %1205 = vmatpush.bf16.msra.mxu3 %v233_v36 }
  0xf3   :  { %291 = vmatpush.bf16.msra.mxu1 %v232_v37  ;;  %1206 = vmatpush.bf16.msra.mxu3 %v232_v37 }
  0xf7   :  { %292 = vmatpush.bf16.msra.mxu1 %v231_v38  ;;  %1207 = vmatpush.bf16.msra.mxu3 %v231_v38 }
  0xfb   :  { %293 = vmatpush.bf16.msra.mxu1 %v230_v39  ;;  %1208 = vmatpush.bf16.msra.mxu3 %v230_v39 }
  0xfe   :  { %294 = vmatmul.bf16.vlgmr.msra.gmra.mxu1 %v1320_v40  ;;  %314 = vmatmul.bf16.vlgmr.msra.gmra.mxu3 %v1325_v41 }
 0x10e   :  { %299 = vmatmul.bf16.gmra.mxu1 %v1332_v42  ;;  %319 = vmatmul.bf16.gmra.mxu3 %v1337_v43 }
 0x11e   :  { %304 = vmatmul.bf16.gmra.mxu1 %v1344_v44  ;;  %324 = vmatmul.bf16.gmra.mxu3 %v1349_v45 }
 0x12e   :  { %309 = vmatmul.bf16.gmra.mxu1 %v1356_v46  ;;  %329 = vmatmul.bf16.gmra.mxu3 %v1361_v47 }
 0x17b   :  { %v1365_v48 = vpop.f32.mrf.mxu1 }
 0x17c   :  { %v356_v60 = vmul.f32 %v1365_v48, %v1365_v48 }
 0x181   :  { %v1367_v49 = vpop.f32.mrf.mxu3 }
 0x182   :  { %v364_v19 = vmul.f32 %v1367_v49, %v1367_v49 }
 0x183   :  { %v1369_v50 = vpop.f32.mrf.mxu1 }
 0x184   :  { %v357_v59 = vmul.f32 %v1369_v50, %v1369_v50  ;;  %v335_v61 = vadd.f32 %v1369_v50, %v1365_v48 }
 0x186   :  { %v372_v63 = vadd.f32 %v357_v59, %v356_v60  ;;  %v1182_v60 = vld [vmem:[%s1829_s5 + $0x28] sm:$0xff] }
 0x187   :  { %541 = vmatpush.bf16.msrb.mxu2 %v1182_v60 }
 0x189   :  { %v1371_v51 = vpop.f32.mrf.mxu3 }
 0x18a   :  { %v365_v23 = vmul.f32 %v1371_v51, %v1371_v51 }
 0x18b   :  { %v1373_v52 = vpop.f32.mrf.mxu1 }
 0x18c   :  { %v358_v62 = vmul.f32 %v1373_v52, %v1373_v52  ;;  %v336_v0 = vadd.f32 %v335_v61, %v1373_v52 }
 0x18e   :  { %v373_v3 = vadd.f32 %v372_v63, %v358_v62 }
 0x191   :  { %v1375_v53 = vpop.f32.mrf.mxu3 }
 0x192   :  { %v366_v27 = vmul.f32 %v1375_v53, %v1375_v53 }
 0x193   :  { %v1377_v54 = vpop.f32.mrf.mxu1 }
 0x194   :  { %v359_v1 = vmul.f32 %v1377_v54, %v1377_v54  ;;  %v337_v4 = vadd.f32 %v336_v0, %v1377_v54 }
 0x196   :  { %v374_v7 = vadd.f32 %v373_v3, %v359_v1 }
 0x199   :  { %v1379_v55 = vpop.f32.mrf.mxu3 }
 0x19a   :  { %v367_v30 = vmul.f32 %v1379_v55, %v1379_v55 }
 0x19b   :  { %v1381_v56 = vpop.f32.mrf.mxu1 }
 0x19c   :  { %v360_v5 = vmul.f32 %v1381_v56, %v1381_v56  ;;  %v338_v8 = vadd.f32 %v337_v4, %v1381_v56  ;;  %v1181_v4 = vld [vmem:[%s1829_s5 + $0x20] sm:$0xff] }
 0x19d   :  { %542 = vmatpush.bf16.msrb.mxu2 %v1181_v4 }
 0x19e   :  { %v375_v10 = vadd.f32 %v374_v7, %v360_v5 }
 0x1a1   :  { %v1385_v58 = vpop.f32.mrf.mxu3 }
 0x1a2   :  { %v368_v34 = vmul.f32 %v1385_v58, %v1385_v58 }
 0x1a3   :  { %v1383_v57 = vpop.f32.mrf.mxu1 }
 0x1a4   :  { %v361_v9 = vmul.f32 %v1383_v57, %v1383_v57  ;;  %v339_v11 = vadd.f32 %v338_v8, %v1383_v57 }
 0x1a6   :  { %v376_v13 = vadd.f32 %v375_v10, %v361_v9  ;;  %v1180_v10 = vld [vmem:[%s1829_s5 + $0x18] sm:$0xff] }
 0x1a7   :  { %543 = vmatpush.bf16.msrb.mxu2 %v1180_v10 }
 0x1a9   :  { %v1403_v6 = vpop.f32.mrf.mxu3 }
 0x1aa   :  { %v369_v37 = vmul.f32 %v1403_v6, %v1403_v6 }
 0x1ab   :  { %v1398_v2 = vpop.f32.mrf.mxu1 }
 0x1ac   :  { %v362_v12 = vmul.f32 %v1398_v2, %v1398_v2  ;;  %v340_v14 = vadd.f32 %v339_v11, %v1398_v2 }
 0x1ae   :  { %v377_v16 = vadd.f32 %v376_v13, %v362_v12 }
 0x1b1   :  { %v1420_v22 = vpop.f32.mrf.mxu3 }
 0x1b2   :  { %v370_v62 = vmul.f32 %v1420_v22, %v1420_v22 }
 0x1b3   :  { %v1412_v15 = vpop.f32.mrf.mxu1 }
 0x1b4   :  { %v341_v17 = vadd.f32 %v340_v14, %v1412_v15  ;;  %v363_v18 = vmul.f32 %v1412_v15, %v1412_v15 }
 0x1b6   :  { %v342_v20 = vadd.f32 %v341_v17, %v1367_v49  ;;  %v378_v21 = vadd.f32 %v377_v16, %v363_v18  ;;  %v1179_v16 = vld [vmem:[%s1829_s5 + $0x10] sm:$0xff] }
 0x1b7   :  { %544 = vmatpush.bf16.msrb.mxu2 %v1179_v16 }
 0x1b8   :  { %v343_v24 = vadd.f32 %v342_v20, %v1371_v51  ;;  %v379_v25 = vadd.f32 %v378_v21, %v364_v19  ;;  %v1178_v21 = vld [vmem:[%s1829_s5 + $0x8] sm:$0xff] }
 0x1b9   :  { %v1443_v59 = vpop.f32.mrf.mxu3 }
 0x1ba   :  { %v344_v28 = vadd.f32 %v343_v24, %v1375_v53  ;;  %v380_v29 = vadd.f32 %v379_v25, %v365_v23  ;;  %v371_v3 = vmul.f32 %v1443_v59, %v1443_v59  ;;  %v1177_v25 = vld [vmem:[%s1829_s5] sm:$0xff] }
 0x1bb   :  { %545 = vmatpush.bf16.msrb.mxu2 %v1178_v21 }
 0x1bc   :  { %v381_v31 = vadd.f32 %v380_v29, %v366_v27  ;;  %v345_v32 = vadd.f32 %v344_v28, %v1379_v55 }
 0x1be   :  { %v346_v35 = vadd.f32 %v345_v32, %v1385_v58  ;;  %v382_v36 = vadd.f32 %v381_v31, %v367_v30 }
 0x1bf   :  { %546 = vmatpush.bf16.msrb.mxu2 %v1177_v25 }
 0x1c0   :  { %v347_v38 = vadd.f32 %v346_v35, %v1403_v6  ;;  %v383_v39 = vadd.f32 %v382_v36, %v368_v34  ;;  %v67_v35 = vld [vmem:[%s1830_s3] sm:$0x1] }
 0x1c2   :  { %v348_v61 = vadd.f32 %v347_v38, %v1420_v22  ;;  %v384_v63 = vadd.f32 %v383_v39, %v369_v37  ;;  %v68_v39 = vld [vmem:[%s1831_s4] sm:$0x1] }
 0x1c4   :  { %v385_v0 = vadd.f32 %v384_v63, %v370_v62  ;;  %v349_v1 = vadd.f32 %v348_v61, %v1443_v59 }
 0x1c6   :  { %v350_v5 = vrot.slane %v349_v1, 4  ;;  %v386_v7 = vadd.f32 %v385_v0, %v371_v3 }
 0x1c8   :  { %v351_v8 = vadd.f32 %v350_v5, %v349_v1  ;;  %v387_v9 = vrot.slane %v386_v7, 4 }
 0x1ca   :  { %v352_v11 = vrot.slane %v351_v8, 2  ;;  %v388_v12 = vadd.f32 %v387_v9, %v386_v7 }
 0x1cc   :  { %v353_v13 = vadd.f32 %v352_v11, %v351_v8  ;;  %v389_v14 = vrot.slane %v388_v12, 2 }
 0x1ce   :  { %v354_v17 = vrot.slane %v353_v13, 1  ;;  %v390_v18 = vadd.f32 %v389_v14, %v388_v12 }
 0x1d0   :  { %v355_v19 = vadd.f32 %v354_v17, %v353_v13  ;;  %v391_v20 = vrot.slane %v390_v18, 1 }
 0x1d2   :  { %v392_v23 = vadd.f32 %v391_v20, %v390_v18  ;;  %v393_v24 = vmul.f32 0.015625, %v355_v19 }
 0x1d4   :  { %v394_v26 = vmul.f32 0.015625, %v392_v23  ;;  %v395_v27 = vmul.f32 %v393_v24, %v393_v24 }
 0x1d6   :  { %v396_v28 = vsub.f32 %v394_v26, %v395_v27 }
 0x1d8   :  { %v397_v29 = vadd.f32 1e-05, %v396_v28 }
 0x1da   :  { %1210 = vrsqrt.f32 %v397_v29  ;;  %vm404_vm1 = vweird.f32 %v397_v29 }
 0x1e0   :  { %v1211_v30 = vpop.eup %1210 }
 0x1e1   :  { %v399_v31 = vmul.f32 %v1211_v30, %v397_v29  ;;  %vm405_vm0 = vweird.f32 %v1211_v30 }
 0x1e2   :  { %vm406_vm2 = vmor %vm404_vm1, %vm405_vm0 }
 0x1e3   :  { %v400_v32 = vmul.f32 %v1211_v30, %v399_v31 }
 0x1e5   :  { %v401_v33 = vmul.f32 0.5, %v400_v32 }
 0x1e7   :  { %v402_v34 = vsub.f32 1.5, %v401_v33 }
 0x1e9   :  { %v403_v36 = vmul.f32 %v1211_v30, %v402_v34 }
 0x1eb   :  { %v407_v37 = vsel %vm406_vm2, %v1211_v30, %v403_v36 }
 0x1ec   :  { %v408_v38 = vmul.f32 %v407_v37, %v67_v35 }
 0x1ee   :  { %v409_v60 = vmul.f32 %v408_v38, %v393_v24  ;;  %v412_v61 = vperm.slane %v408_v38, 0 }
 0x1f0   :  { %v410_v62 = vsub.f32 %v68_v39, %v409_v60  ;;  %v414_v0 = vmul.f32 %v412_v61, %v1365_v48  ;;  %v415_v1 = vmul.f32 %v412_v61, %v1369_v50  ;;  %v422_v8 = vmul.f32 %v412_v61, %v1367_v49 }
 0x1f1   :  { %v423_v9 = vmul.f32 %v412_v61, %v1371_v51  ;;  %v424_v10 = vmul.f32 %v412_v61, %v1375_v53  ;;  %v425_v11 = vmul.f32 %v412_v61, %v1379_v55  ;;  %v426_v13 = vmul.f32 %v412_v61, %v1385_v58 }
 0x1f2   :  { %v431_v63 = vperm.slane %v410_v62, 0  ;;  %v429_v14 = vmul.f32 %v412_v61, %v1443_v59  ;;  %v427_v53 = vmul.f32 %v412_v61, %v1403_v6  ;;  %v428_v16 = vmul.f32 %v412_v61, %v1420_v22 }
 0x1f3   :  { %v416_v58 = vmul.f32 %v412_v61, %v1373_v52  ;;  %v417_v59 = vmul.f32 %v412_v61, %v1377_v54  ;;  %v418_v24 = vmul.f32 %v412_v61, %v1381_v56  ;;  %v419_v52 = vmul.f32 %v412_v61, %v1383_v57 }
 0x1f4   :  { %v1477_v3 = vadd.f32 %v431_v63, %v414_v0  ;;  %v1479_v4 = vadd.f32 %v431_v63, %v415_v1  ;;  %v1491_v50 = vadd.f32 %v431_v63, %v422_v8  ;;  %v1493_v12 = vadd.f32 %v431_v63, %v423_v9 }
 0x1f5   :  { %v1497_v49 = vadd.f32 %v431_v63, %v424_v10  ;;  %v1499_v51 = vadd.f32 %v431_v63, %v425_v11  ;;  %v1502_v55 = vadd.f32 %v431_v63, %v426_v13  ;;  %v1505_v17 = vadd.f32 %v431_v63, %v429_v14 }
 0x1f6   :  { %v449_v5 = vmax.f32 %v1477_v3, 0.0  ;;  %v450_v7 = vmax.f32 %v1479_v4, 0.0  ;;  %v1507_v18 = vadd.f32 %v431_v63, %v427_v53  ;;  %v1509_v19 = vadd.f32 %v431_v63, %v428_v16 }
 0x1f7   :  { %v1513_v20 = vadd.f32 %v431_v63, %v416_v58  ;;  %v1515_v21 = vadd.f32 %v431_v63, %v417_v59  ;;  %v1525_v25 = vadd.f32 %v431_v63, %v418_v24  ;;  %v1527_v54 = vadd.f32 %v431_v63, %v419_v52 }
 0x1f8   :  { %v483_v48 = vpack.c.bf16 %v450_v7, %v449_v5  ;;  %v420_v29 = vmul.f32 %v412_v61, %v1398_v2  ;;  %v421_v56 = vmul.f32 %v412_v61, %v1412_v15  ;;  %v457_v34 = vmax.f32 %v1491_v50, 0.0 }
 0x1f9   :  { %v1842_v6 = vmax.f32 %v1513_v20, 0.0  ;;  %v1841_v23 = vmax.f32 %v1515_v21, 0.0  ;;  %v1840_v26 = vmax.f32 %v1525_v25, 0.0  ;;  %v1839_v27 = vmax.f32 %v1527_v54, 0.0 }
 0x1fa   :  { %547 = vmatmul.bf16.vlgmr.msrb.gmra.mxu2 %v483_v48  ;;  %v1537_v30 = vadd.f32 %v431_v63, %v420_v29  ;;  %v1539_v57 = vadd.f32 %v431_v63, %v421_v56  ;;  %v458_v2 = vmax.f32 %v1493_v12, 0.0  ;;  %v459_v35 = vmax.f32 %v1497_v49, 0.0 }
 0x1fb   :  { %v484_v22 = vpack.c.bf16 %v1841_v23, %v1842_v6  ;;  %v485_v28 = vpack.c.bf16 %v1839_v27, %v1840_v26  ;;  %v460_v36 = vmax.f32 %v1499_v51, 0.0  ;;  %v461_v38 = vmax.f32 %v1502_v55, 0.0 }
 0x1fc   :  { %v1838_v31 = vmax.f32 %v1537_v30, 0.0  ;;  %v1837_v32 = vmax.f32 %v1539_v57, 0.0  ;;  %v487_v15 = vpack.c.bf16 %v458_v2, %v457_v34  ;;  %v1844_v39 = vmax.f32 %v1507_v18, 0.0 }
 0x1fd   :  { %v488_v37 = vpack.c.bf16 %v460_v36, %v459_v35  ;;  %v1843_v61 = vmax.f32 %v1509_v19, 0.0  ;;  %v464_v62 = vmax.f32 %v1505_v17, 0.0  ;;  %v1845_v49 = vmax.f32 %v1507_v18, 0.0 }
 0x1fe   :  { %v486_v33 = vpack.c.bf16 %v1837_v32, %v1838_v31  ;;  %v489_v60 = vpack.c.bf16 %v1844_v39, %v461_v38  ;;  %v1848_v55 = vmax.f32 %v1515_v21, 0.0  ;;  %v1850_v21 = vmax.f32 %v1527_v54, 0.0 }
 0x1ff   :  { %v490_v63 = vpack.c.bf16 %v464_v62, %v1843_v61  ;;  %v1852_v54 = vmax.f32 %v1539_v57, 0.0 }
 0x20a   :  { %552 = vmatmul.bf16.gmra.mxu2 %v484_v22 }
 0x21a   :  { %557 = vmatmul.bf16.gmra.mxu2 %v485_v28 }
 0x22a   :  { %562 = vmatmul.bf16.gmra.mxu2 %v486_v33 }
 0x23a   :  { %567 = vmatmul.bf16.gmra.mxu2 %v487_v15 }
 0x24a   :  { %572 = vmatmul.bf16.gmra.mxu2 %v488_v37 }
 0x25a   :  { %577 = vmatmul.bf16.gmra.mxu2 %v489_v60 }
 0x26a   :  { %582 = vmatmul.bf16.gmra.mxu2 %v490_v63 }
 0x27d   :  { %v548_v0 = vpop.f32.mrf.mxu2 }
 0x285   :  { %v550_v1 = vpop.f32.mrf.mxu2 }
 0x286   :  { %v588_v8 = vpack.c.bf16 %v550_v1, %v548_v0 }
 0x28d   :  { %v553_v9 = vpop.f32.mrf.mxu2 }
 0x295   :  { %v555_v10 = vpop.f32.mrf.mxu2 }
 0x296   :  { %v589_v11 = vpack.c.bf16 %v555_v10, %v553_v9 }
 0x29d   :  { %v558_v48 = vpop.f32.mrf.mxu2 }
 0x2a5   :  { %v560_v13 = vpop.f32.mrf.mxu2 }
 0x2a6   :  { %v590_v14 = vpack.c.bf16 %v560_v13, %v558_v48 }
 0x2ad   :  { %v563_v53 = vpop.f32.mrf.mxu2 }
 0x2b5   :  { %v565_v16 = vpop.f32.mrf.mxu2 }
 0x2b6   :  { %v591_v58 = vpack.c.bf16 %v565_v16, %v563_v53 }
 0x2bd   :  { %v568_v59 = vpop.f32.mrf.mxu2 }
 0x2c5   :  { %v570_v22 = vpop.f32.mrf.mxu2 }
 0x2c6   :  { %v592_v63 = vpack.c.bf16 %v570_v22, %v568_v59 }
 0x2cd   :  { %v573_v24 = vpop.f32.mrf.mxu2 }
 0x2d5   :  { %v575_v52 = vpop.f32.mrf.mxu2 }
 0x2d6   :  { %v593_v60 = vpack.c.bf16 %v575_v52, %v573_v24 }
 0x2dd   :  { %v578_v28 = vpop.f32.mrf.mxu2 }
 0x2e5   :  { %v580_v29 = vpop.f32.mrf.mxu2 }
 0x2e6   :  { %v594_v37 = vpack.c.bf16 %v580_v29, %v578_v28 }
 0x2ed   :  { %v583_v56 = vpop.f32.mrf.mxu2 }
 0x2f5   :  { %v585_v33 = vpop.f32.mrf.mxu2 }
 0x2f6   :  { %v595_v15 = vpack.c.bf16 %v585_v33, %v583_v56 }
 0x2f8   :  { %596 = vmatpush.bf16.msrb.mxu3 %v595_v15 }
 0x2fc   :  { %597 = vmatpush.bf16.msrb.mxu3 %v594_v37 }
 0x300   :  { %598 = vmatpush.bf16.msrb.mxu3 %v593_v60 }
 0x304   :  { %599 = vmatpush.bf16.msrb.mxu3 %v592_v63 }
 0x308   :  { %600 = vmatpush.bf16.msrb.mxu3 %v591_v58 }
 0x30c   :  { %601 = vmatpush.bf16.msrb.mxu3 %v590_v14 }
 0x310   :  { %602 = vmatpush.bf16.msrb.mxu3 %v589_v11 }
 0x314   :  { %603 = vmatpush.bf16.msrb.mxu3 %v588_v8 }
 0x317   :  { %604 = vmatmul.bf16.vlgmr.msrb.gmra.mxu3 %v1320_v40 }
 0x327   :  { %609 = vmatmul.bf16.gmra.mxu3 %v1332_v42 }
 0x337   :  { %614 = vmatmul.bf16.gmra.mxu3 %v1344_v44 }
 0x347   :  { %619 = vmatmul.bf16.gmra.mxu3 %v1356_v46 }
 0x357   :  { %624 = vmatmul.bf16.gmra.mxu3 %v1325_v41 }
 0x367   :  { %629 = vmatmul.bf16.gmra.mxu3 %v1337_v43 }
 0x377   :  { %634 = vmatmul.bf16.gmra.mxu3 %v1349_v45 }
 0x387   :  { %639 = vmatmul.bf16.gmra.mxu3 %v1361_v47 }
 0x39a   :  { %v1579_v0 = vpop.f32.mrf.mxu3 }
 0x39b   :  { %v666_v22 = vmul.f32 %v1579_v0, %v1579_v0 }
 0x3a2   :  { %v1581_v1 = vpop.f32.mrf.mxu3 }
 0x3a3   :  { %v667_v59 = vmul.f32 %v1581_v1, %v1581_v1  ;;  %v645_v24 = vadd.f32 %v1581_v1, %v1579_v0 }
 0x3a5   :  { %v682_v28 = vadd.f32 %v667_v59, %v666_v22 }
 0x3aa   :  { %v1583_v8 = vpop.f32.mrf.mxu3 }
 0x3ab   :  { %v668_v52 = vmul.f32 %v1583_v8, %v1583_v8  ;;  %v646_v29 = vadd.f32 %v645_v24, %v1583_v8 }
 0x3ad   :  { %v683_v15 = vadd.f32 %v682_v28, %v668_v52 }
 0x3b2   :  { %v1585_v9 = vpop.f32.mrf.mxu3 }
 0x3b3   :  { %v669_v56 = vmul.f32 %v1585_v9, %v1585_v9  ;;  %v647_v37 = vadd.f32 %v646_v29, %v1585_v9 }
 0x3b5   :  { %v684_v63 = vadd.f32 %v683_v15, %v669_v56 }
 0x3ba   :  { %v1587_v10 = vpop.f32.mrf.mxu3 }
 0x3bb   :  { %v670_v60 = vmul.f32 %v1587_v10, %v1587_v10  ;;  %v648_v32 = vadd.f32 %v647_v37, %v1587_v10 }
 0x3bd   :  { %v685_v59 = vadd.f32 %v684_v63, %v670_v60 }
 0x3c2   :  { %v1589_v11 = vpop.f32.mrf.mxu3 }
 0x3c3   :  { %v671_v31 = vmul.f32 %v1589_v11, %v1589_v11  ;;  %v649_v22 = vadd.f32 %v648_v32, %v1589_v11 }
 0x3c5   :  { %v686_v27 = vadd.f32 %v685_v59, %v671_v31 }
 0x3ca   :  { %v1591_v48 = vpop.f32.mrf.mxu3 }
 0x3cb   :  { %v672_v24 = vmul.f32 %v1591_v48, %v1591_v48  ;;  %v650_v52 = vadd.f32 %v649_v22, %v1591_v48 }
 0x3cd   :  { %v687_v56 = vadd.f32 %v686_v27, %v672_v24 }
 0x3d2   :  { %v1593_v13 = vpop.f32.mrf.mxu3 }
 0x3d3   :  { %v673_v28 = vmul.f32 %v1593_v13, %v1593_v13  ;;  %v651_v15 = vadd.f32 %v650_v52, %v1593_v13 }
 0x3d5   :  { %v688_v60 = vadd.f32 %v687_v56, %v673_v28 }
 0x3da   :  { %v1595_v14 = vpop.f32.mrf.mxu3 }
 0x3db   :  { %v674_v37 = vmul.f32 %v1595_v14, %v1595_v14  ;;  %v652_v32 = vadd.f32 %v651_v15, %v1595_v14 }
 0x3dd   :  { %v689_v31 = vadd.f32 %v688_v60, %v674_v37 }
 0x3e2   :  { %v1597_v53 = vpop.f32.mrf.mxu3 }
 0x3e3   :  { %v675_v63 = vmul.f32 %v1597_v53, %v1597_v53  ;;  %v653_v59 = vadd.f32 %v652_v32, %v1597_v53 }
 0x3e5   :  { %v690_v26 = vadd.f32 %v689_v31, %v675_v63 }
 0x3ea   :  { %v1599_v16 = vpop.f32.mrf.mxu3 }
 0x3eb   :  { %v676_v22 = vmul.f32 %v1599_v16, %v1599_v16  ;;  %v654_v27 = vadd.f32 %v653_v59, %v1599_v16 }
 0x3ed   :  { %v691_v28 = vadd.f32 %v690_v26, %v676_v22 }
 0x3f2   :  { %v1601_v58 = vpop.f32.mrf.mxu3 }
 0x3f3   :  { %v677_v24 = vmul.f32 %v1601_v58, %v1601_v58  ;;  %v655_v56 = vadd.f32 %v654_v27, %v1601_v58 }
 0x3f5   :  { %v692_v37 = vadd.f32 %v691_v28, %v677_v24  ;;  %v1192_v28 = vld [vmem:[%s1832_s8 + $0x38] sm:$0xff] }
 0x3f6   :  { %864 = vmatpush.bf16.msrb.mxu0 %v1192_v28 }
 0x3fa   :  { %v1614_v33 = vpop.f32.mrf.mxu3 }
 0x3fb   :  { %v678_v15 = vmul.f32 %v1614_v33, %v1614_v33  ;;  %v656_v60 = vadd.f32 %v655_v56, %v1614_v33 }
 0x3fd   :  { %v693_v63 = vadd.f32 %v692_v37, %v678_v15 }
 0x402   :  { %v1628_v29 = vpop.f32.mrf.mxu3 }
 0x403   :  { %v679_v32 = vmul.f32 %v1628_v29, %v1628_v29  ;;  %v657_v31 = vadd.f32 %v656_v60, %v1628_v29 }
 0x405   :  { %v694_v23 = vadd.f32 %v693_v63, %v679_v32  ;;  %v1191_v32 = vld [vmem:[%s1832_s8 + $0x30] sm:$0xff] }
 0x406   :  { %865 = vmatpush.bf16.msrb.mxu0 %v1191_v32  ;;  %v1187_v32 = vld [vmem:[%s1832_s8 + $0x10] sm:$0xff] }
 0x40a   :  { %v1642_v52 = vpop.f32.mrf.mxu3 }
 0x40b   :  { %v680_v59 = vmul.f32 %v1642_v52, %v1642_v52  ;;  %v658_v26 = vadd.f32 %v657_v31, %v1642_v52 }
 0x40d   :  { %v695_v27 = vadd.f32 %v694_v23, %v680_v59 }
 0x412   :  { %v642_v22 = vpop.f32.mrf.mxu3 }
 0x413   :  { %v659_v6 = vadd.f32 %v658_v26, %v642_v22  ;;  %v681_v61 = vmul.f32 %v642_v22, %v642_v22 }
 0x415   :  { %v660_v39 = vrot.slane %v659_v6, 4  ;;  %v696_v24 = vadd.f32 %v695_v27, %v681_v61  ;;  %v1190_v61 = vld [vmem:[%s1832_s8 + $0x28] sm:$0xff] }
 0x416   :  { %866 = vmatpush.bf16.msrb.mxu0 %v1190_v61 }
 0x417   :  { %v661_v56 = vadd.f32 %v660_v39, %v659_v6  ;;  %v697_v15 = vrot.slane %v696_v24, 4 }
 0x419   :  { %v662_v37 = vrot.slane %v661_v56, 2  ;;  %v698_v60 = vadd.f32 %v697_v15, %v696_v24  ;;  %v1189_v24 = vld [vmem:[%s1832_s8 + $0x20] sm:$0xff] }
 0x41a   :  { %867 = vmatpush.bf16.msrb.mxu0 %v1189_v24 }
 0x41b   :  { %v663_v63 = vadd.f32 %v662_v37, %v661_v56  ;;  %v699_v31 = vrot.slane %v698_v60, 2  ;;  %v1188_v37 = vld [vmem:[%s1832_s8 + $0x18] sm:$0xff] }
 0x41d   :  { %v664_v23 = vrot.slane %v663_v63, 1  ;;  %v700_v59 = vadd.f32 %v699_v31, %v698_v60 }
 0x41e   :  { %868 = vmatpush.bf16.msrb.mxu0 %v1188_v37 }
 0x41f   :  { %v665_v26 = vadd.f32 %v664_v23, %v663_v63  ;;  %v701_v27 = vrot.slane %v700_v59, 1  ;;  %v1186_v63 = vld [vmem:[%s1832_s8 + $0x8] sm:$0xff]  ;;  %v1185_v23 = vld [vmem:[%s1832_s8] sm:$0xff] }
 0x421   :  { %v702_v6 = vadd.f32 %v701_v27, %v700_v59  ;;  %v703_v39 = vmul.f32 0.015625, %v665_v26 }
 0x422   :  { %869 = vmatpush.bf16.msrb.mxu0 %v1187_v32 }
 0x423   :  { %v704_v28 = vmul.f32 0.015625, %v702_v6  ;;  %v705_v15 = vmul.f32 %v703_v39, %v703_v39  ;;  %v481_v6 = vld [vmem:[%s1833_s6] sm:$0x1] }
 0x425   :  { %v706_v56 = vsub.f32 %v704_v28, %v705_v15 }
 0x426   :  { %870 = vmatpush.bf16.msrb.mxu0 %v1186_v63 }
 0x427   :  { %v707_v60 = vadd.f32 1e-05, %v706_v56  ;;  %v482_v56 = vld [vmem:[%s1834_s7] sm:$0x1] }
 0x429   :  { %1212 = vrsqrt.f32 %v707_v60  ;;  %vm714_vm4 = vweird.f32 %v707_v60 }
 0x42a   :  { %871 = vmatpush.bf16.msrb.mxu0 %v1185_v23 }
 0x42f   :  { %v1213_v31 = vpop.eup %1212 }
 0x430   :  { %v709_v59 = vmul.f32 %v1213_v31, %v707_v60  ;;  %vm715_vm3 = vweird.f32 %v1213_v31 }
 0x431   :  { %vm716_vm5 = vmor %vm714_vm4, %vm715_vm3 }
 0x432   :  { %v710_v61 = vmul.f32 %v1213_v31, %v709_v59 }
 0x434   :  { %v711_v26 = vmul.f32 0.5, %v710_v61 }
 0x436   :  { %v712_v27 = vsub.f32 1.5, %v711_v26 }
 0x438   :  { %v713_v24 = vmul.f32 %v1213_v31, %v712_v27 }
 0x43a   :  { %v717_v28 = vsel %vm716_vm5, %v1213_v31, %v713_v24 }
 0x43b   :  { %v718_v15 = vmul.f32 %v717_v28, %v481_v6 }
 0x43d   :  { %v719_v37 = vmul.f32 %v718_v15, %v703_v39  ;;  %v1684_v32 = vperm.slane %v718_v15, 0 }
 0x43f   :  { %v720_v63 = vsub.f32 %v482_v56, %v719_v37  ;;  %v739_v23 = vmul.f32 %v1684_v32, %v642_v22  ;;  %v724_v61 = vmul.f32 %v1684_v32, %v1579_v0  ;;  %v725_v60 = vmul.f32 %v1684_v32, %v1581_v1 }
 0x440   :  { %v732_v0 = vmul.f32 %v1684_v32, %v1595_v14  ;;  %v733_v1 = vmul.f32 %v1684_v32, %v1597_v53  ;;  %v726_v28 = vmul.f32 %v1684_v32, %v1583_v8  ;;  %v727_v15 = vmul.f32 %v1684_v32, %v1585_v9 }
 0x441   :  { %v1687_v59 = vperm.slane %v720_v63, 0  ;;  %v734_v56 = vmul.f32 %v1684_v32, %v1599_v16  ;;  %v736_v9 = vmul.f32 %v1684_v32, %v1614_v33  ;;  %v728_v17 = vmul.f32 %v1684_v32, %v1587_v10 }
 0x442   :  { %v729_v18 = vmul.f32 %v1684_v32, %v1589_v11  ;;  %v730_v10 = vmul.f32 %v1684_v32, %v1591_v48  ;;  %v731_v11 = vmul.f32 %v1684_v32, %v1593_v13 }
 0x443   :  { %v758_v31 = vadd.f32 %v1687_v59, %v739_v23  ;;  %v743_v26 = vadd.f32 %v1687_v59, %v724_v61  ;;  %v744_v27 = vadd.f32 %v1687_v59, %v725_v60  ;;  %v752_v4 = vadd.f32 %v1687_v59, %v733_v1 }
 0x444   :  { %v745_v14 = vadd.f32 %v1687_v59, %v726_v28  ;;  %v746_v53 = vadd.f32 %v1687_v59, %v727_v15  ;;  %v753_v8 = vadd.f32 %v1687_v59, %v734_v56  ;;  %v737_v23 = vmul.f32 %v1684_v32, %v1628_v29 }
 0x445   :  { %v759_v39 = vmax.f32 %v743_v26, 0.0  ;;  %v760_v6 = vmax.f32 %v744_v27, 0.0  ;;  %v768_v16 = vmax.f32 %v752_v4, 0.0  ;;  %v774_v61 = vmax.f32 %v758_v31, 0.0 }
 0x446   :  { %v769_v60 = vmax.f32 %v753_v8, 0.0  ;;  %v738_v26 = vmul.f32 %v1684_v32, %v1642_v52  ;;  %v762_v1 = vmax.f32 %v746_v53, 0.0  ;;  %v1846_v15 = vmax.f32 %v1509_v19, 0.0 }
 0x447   :  { %v775_v24 = vadd.f32 %v759_v39, %v449_v5  ;;  %v776_v22 = vadd.f32 %v760_v6, %v450_v7  ;;  %v751_v5 = vadd.f32 %v1687_v59, %v732_v0  ;;  %v735_v7 = vmul.f32 %v1684_v32, %v1601_v58 }
 0x448   :  { %v755_v58 = vadd.f32 %v1687_v59, %v736_v9  ;;  %v784_v33 = vadd.f32 %v768_v16, %v458_v2  ;;  %v756_v6 = vadd.f32 %v1687_v59, %v737_v23  ;;  %v757_v31 = vadd.f32 %v1687_v59, %v738_v26 }
 0x449   :  { %v808_v3 = vpack.c.bf16 %v776_v22, %v775_v24  ;;  %v767_v37 = vmax.f32 %v751_v5, 0.0  ;;  %v754_v63 = vadd.f32 %v1687_v59, %v735_v7  ;;  %v785_v24 = vadd.f32 %v769_v60, %v459_v35 }
 0x44a   :  { %v771_v29 = vmax.f32 %v755_v58, 0.0  ;;  %v772_v52 = vmax.f32 %v756_v6, 0.0  ;;  %v790_v12 = vadd.f32 %v774_v61, %v464_v62  ;;  %v761_v2 = vmax.f32 %v745_v14, 0.0 }
 0x44b   :  { %872 = vmatmul.bf16.vlgmr.msrb.gmra.mxu0 %v808_v3  ;;  %v783_v27 = vadd.f32 %v767_v37, %v457_v34  ;;  %v770_v39 = vmax.f32 %v754_v63, 0.0  ;;  %v773_v34 = vmax.f32 %v757_v31, 0.0  ;;  %v747_v62 = vadd.f32 %v1687_v59, %v728_v17 }
 0x44c   :  { %v787_v50 = vadd.f32 %v771_v29, %v461_v38  ;;  %v788_v35 = vadd.f32 %v772_v52, %v1845_v49  ;;  %v778_v38 = vadd.f32 %v762_v1, %v1848_v55  ;;  %v748_v19 = vadd.f32 %v1687_v59, %v729_v18 }
 0x44d   :  { %v812_v22 = vpack.c.bf16 %v784_v33, %v783_v27  ;;  %v786_v0 = vadd.f32 %v770_v39, %v460_v36  ;;  %v789_v56 = vadd.f32 %v773_v34, %v1846_v15  ;;  %v1847_v36 = vmax.f32 %v1513_v20, 0.0 }
 0x44e   :  { %v814_v3 = vpack.c.bf16 %v788_v35, %v787_v50  ;;  %v763_v7 = vmax.f32 %v747_v62, 0.0  ;;  %v764_v14 = vmax.f32 %v748_v19, 0.0  ;;  %v1849_v20 = vmax.f32 %v1525_v25, 0.0  ;;  %v1209_v35 = vld [vmem:[%s1835_s9] ss:$0 sm:$0xff] }
 0x44f   :  { %v813_v28 = vpack.c.bf16 %v786_v0, %v785_v24  ;;  %v815_v51 = vpack.c.bf16 %v790_v12, %v789_v56  ;;  %v777_v5 = vadd.f32 %v761_v2, %v1847_v36  ;;  %v749_v37 = vadd.f32 %v1687_v59, %v730_v10 }
 0x450   :  { %v779_v53 = vadd.f32 %v763_v7, %v1849_v20  ;;  %v780_v8 = vadd.f32 %v764_v14, %v1850_v21  ;;  %v750_v16 = vadd.f32 %v1687_v59, %v731_v11  ;;  %v1851_v25 = vmax.f32 %v1537_v30, 0.0 }
 0x451   :  { %v809_v4 = vpack.c.bf16 %v778_v38, %v777_v5  ;;  %v765_v63 = vmax.f32 %v749_v37, 0.0 }
 0x452   :  { %v810_v9 = vpack.c.bf16 %v780_v8, %v779_v53  ;;  %v766_v23 = vmax.f32 %v750_v16, 0.0 }
 0x453   :  { %v781_v61 = vadd.f32 %v765_v63, %v1851_v25 }
 0x454   :  { %v782_v60 = vadd.f32 %v766_v23, %v1852_v54 }
 0x456   :  { %v811_v58 = vpack.c.bf16 %v782_v60, %v781_v61 }
 0x45b   :  { %877 = vmatmul.bf16.gmra.mxu0 %v809_v4 }
 0x46b   :  { %882 = vmatmul.bf16.gmra.mxu0 %v810_v9 }
 0x47b   :  { %887 = vmatmul.bf16.gmra.mxu0 %v811_v58 }
 0x48b   :  { %892 = vmatmul.bf16.gmra.mxu0 %v812_v22 }
 0x49b   :  { %897 = vmatmul.bf16.gmra.mxu0 %v813_v28 }
 0x4ab   :  { %902 = vmatmul.bf16.gmra.mxu0 %v814_v3 }
 0x4bb   :  { %907 = vmatmul.bf16.gmra.mxu0 %v815_v51 }
 0x4c8   :  { %v873_v48 = vpop.f32.mrf.mxu0 }
 0x4d0   :  { %v875_v13 = vpop.f32.mrf.mxu0 }
 0x4d1   :  { %v913_v32 = vpack.c.bf16 %v875_v13, %v873_v48 }
 0x4d8   :  { %v878_v26 = vpop.f32.mrf.mxu0 }
 0x4e0   :  { %v880_v27 = vpop.f32.mrf.mxu0 }
 0x4e1   :  { %v914_v59 = vpack.c.bf16 %v880_v27, %v878_v26 }
 0x4e8   :  { %v883_v33 = vpop.f32.mrf.mxu0 }
 0x4f0   :  { %v885_v39 = vpop.f32.mrf.mxu0 }
 0x4f1   :  { %v915_v6 = vpack.c.bf16 %v885_v39, %v883_v33 }
 0x4f8   :  { %v888_v30 = vpop.f32.mrf.mxu0 }
 0x500   :  { %v890_v24 = vpop.f32.mrf.mxu0 }
 0x501   :  { %v916_v29 = vpack.c.bf16 %v890_v24, %v888_v30 }
 0x508   :  { %v893_v57 = vpop.f32.mrf.mxu0 }
 0x510   :  { %v895_v31 = vpop.f32.mrf.mxu0 }
 0x511   :  { %v917_v49 = vpack.c.bf16 %v895_v31, %v893_v57 }
 0x518   :  { %v898_v0 = vpop.f32.mrf.mxu0 }
 0x520   :  { %v900_v52 = vpop.f32.mrf.mxu0 }
 0x521   :  { %v918_v28 = vpack.c.bf16 %v900_v52, %v898_v0 }
 0x528   :  { %v903_v22 = vpop.f32.mrf.mxu0 }
 0x530   :  { %v905_v50 = vpop.f32.mrf.mxu0 }
 0x531   :  { %v919_v1 = vpack.c.bf16 %v905_v50, %v903_v22 }
 0x538   :  { %v908_v34 = vpop.f32.mrf.mxu0 }
 0x540   :  { %v910_v12 = vpop.f32.mrf.mxu0 }
 0x541   :  { %v920_v2 = vpack.c.bf16 %v910_v12, %v908_v34 }
 0x543   :  { %924 = vmatpush.bf16.msrb.mxu1 %v920_v2 }
 0x547   :  { %925 = vmatpush.bf16.msrb.mxu1 %v919_v1 }
 0x54b   :  { %926 = vmatpush.bf16.msrb.mxu1 %v918_v28 }
 0x54f   :  { %927 = vmatpush.bf16.msrb.mxu1 %v917_v49 }
 0x553   :  { %928 = vmatpush.bf16.msrb.mxu1 %v916_v29 }
 0x557   :  { %929 = vmatpush.bf16.msrb.mxu1 %v915_v6 }
 0x55b   :  { %930 = vmatpush.bf16.msrb.mxu1 %v914_v59 }
 0x55f   :  { %931 = vmatpush.bf16.msrb.mxu1 %v913_v32 }
 0x562   :  { %932 = vmatmul.bf16.vlgmr.msrb.gmra.mxu1 %v1320_v40 }
 0x572   :  { %937 = vmatmul.bf16.gmra.mxu1 %v1332_v42 }
 0x582   :  { %942 = vmatmul.bf16.gmra.mxu1 %v1344_v44 }
 0x592   :  { %947 = vmatmul.bf16.gmra.mxu1 %v1356_v46 }
 0x5a2   :  { %952 = vmatmul.bf16.gmra.mxu1 %v1325_v41 }
 0x5b2   :  { %957 = vmatmul.bf16.gmra.mxu1 %v1337_v43 }
 0x5c2   :  { %962 = vmatmul.bf16.gmra.mxu1 %v1349_v45 }
 0x5d2   :  { %967 = vmatmul.bf16.gmra.mxu1 %v1361_v47 }
 0x5df   :  { %v933_v15 = vpop.f32.mrf.mxu1 }
 0x5e0   :  { %v934_v40 = vadd.f32 %v1209_v35, %v933_v15 }
 0x5e2   :  { %973 = vst [vmem:[%s1836_s10] sm:$0xff] %v934_v40 }
 0x5e7   :  { %v935_v42 = vpop.f32.mrf.mxu1 }
 0x5e8   :  { %v936_v44 = vadd.f32 %v1209_v35, %v935_v42 }
 0x5ea   :  { %974 = vst [vmem:[%s1836_s10 + $0x8] sm:$0xff] %v936_v44 }
 0x5ef   :  { %v938_v41 = vpop.f32.mrf.mxu1 }
 0x5f0   :  { %v939_v43 = vadd.f32 %v1209_v35, %v938_v41 }
 0x5f2   :  { %975 = vst [vmem:[%s1836_s10 + $0x10] sm:$0xff] %v939_v43 }
 0x5f7   :  { %v940_v45 = vpop.f32.mrf.mxu1 }
 0x5f8   :  { %v941_v46 = vadd.f32 %v1209_v35, %v940_v45 }
 0x5fa   :  { %976 = vst [vmem:[%s1836_s10 + $0x18] sm:$0xff] %v941_v46 }
 0x5ff   :  { %v943_v47 = vpop.f32.mrf.mxu1 }
 0x600   :  { %v944_v56 = vadd.f32 %v1209_v35, %v943_v47 }
 0x602   :  { %977 = vst [vmem:[%s1836_s10 + $0x20] sm:$0xff] %v944_v56 }
 0x607   :  { %v945_v3 = vpop.f32.mrf.mxu1 }
 0x608   :  { %v946_v51 = vadd.f32 %v1209_v35, %v945_v3 }
 0x60a   :  { %978 = vst [vmem:[%s1836_s10 + $0x28] sm:$0xff] %v946_v51 }
 0x60f   :  { %v948_v36 = vpop.f32.mrf.mxu1 }
 0x610   :  { %v949_v5 = vadd.f32 %v1209_v35, %v948_v36 }
 0x612   :  { %979 = vst [vmem:[%s1836_s10 + $0x30] sm:$0xff] %v949_v5 }
 0x617   :  { %v950_v55 = vpop.f32.mrf.mxu1 }
 0x618   :  { %v951_v38 = vadd.f32 %v1209_v35, %v950_v55 }
 0x61a   :  { %980 = vst [vmem:[%s1836_s10 + $0x38] sm:$0xff] %v951_v38 }
 0x61f   :  { %v953_v4 = vpop.f32.mrf.mxu1 }
 0x620   :  { %v954_v17 = vadd.f32 %v1209_v35, %v953_v4 }
 0x622   :  { %981 = vst [vmem:[%s1836_s10 + $0x40] sm:$0xff] %v954_v17 }
 0x627   :  { %v955_v18 = vpop.f32.mrf.mxu1 }
 0x628   :  { %v956_v62 = vadd.f32 %v1209_v35, %v955_v18 }
 0x62a   :  { %982 = vst [vmem:[%s1836_s10 + $0x48] sm:$0xff] %v956_v62 }
 0x62f   :  { %v958_v19 = vpop.f32.mrf.mxu1 }
 0x630   :  { %v959_v7 = vadd.f32 %v1209_v35, %v958_v19 }
 0x632   :  { %983 = vst [vmem:[%s1836_s10 + $0x50] sm:$0xff] %v959_v7 }
 0x637   :  { %v960_v14 = vpop.f32.mrf.mxu1 }
 0x638   :  { %v961_v20 = vadd.f32 %v1209_v35, %v960_v14 }
 0x63a   :  { %984 = vst [vmem:[%s1836_s10 + $0x58] sm:$0xff] %v961_v20 }
 0x63f   :  { %v963_v53 = vpop.f32.mrf.mxu1 }
 0x640   :  { %v964_v21 = vadd.f32 %v1209_v35, %v963_v53 }
 0x642   :  { %985 = vst [vmem:[%s1836_s10 + $0x60] sm:$0xff] %v964_v21 }
 0x647   :  { %v965_v8 = vpop.f32.mrf.mxu1 }
 0x648   :  { %v966_v9 = vadd.f32 %v1209_v35, %v965_v8 }
 0x64a   :  { %986 = vst [vmem:[%s1836_s10 + $0x68] sm:$0xff] %v966_v9 }
 0x64f   :  { %v968_v10 = vpop.f32.mrf.mxu1 }
 0x650   :  { %v969_v11 = vadd.f32 %v1209_v35, %v968_v10 }
 0x652   :  { %987 = vst [vmem:[%s1836_s10 + $0x70] sm:$0xff] %v969_v11 }
 0x657   :  { %v970_v37 = vpop.f32.mrf.mxu1 }
 0x658   :  { %v971_v16 = vadd.f32 %v1209_v35, %v970_v37 }
 0x65a   :  { %988 = vst [vmem:[%s1836_s10 + $0x78] sm:$0xff] %v971_v16 }

</bundles_post_ra>
